<compile_context>
chip_gen: v5e
topology: v5e:2x2
jax: 0.10.0
libtpu: 0.0.40
codegen_flags: <defaults>
</compile_context>

<pallas_src>
import functools

import jax
import jax.numpy as jnp
from jax.experimental import pallas as pl
from jax.experimental.pallas import tpu as pltpu


def highway_kernel(x_ref, w_ref, b_ref, o_ref, *, num_layers, size):
    # x_ref: (TB, S); w_ref: (L, S, 3S) bf16; b_ref: (L, 3S) f32; o_ref: (TB, S)
    x = x_ref[...].astype(jnp.float32)
    for layer in range(num_layers):  # static unroll; num_layers is small
        w = w_ref[layer]                                # (S, 3S), bf16
        b = b_ref[layer].astype(jnp.float32)[None, :]   # (1, 3S)
        # One fused MXU matmul per layer (N = 3S is lane-dense), f32 accumulate.
        h = jnp.dot(x.astype(w.dtype), w,
                    preferred_element_type=jnp.float32) + b
        gate = jax.nn.sigmoid(h[:, :size])              # sigmoid -> EUP slot
        nonlinear = jax.nn.relu(h[:, size:2 * size])    # VPU max
        linear = h[:, 2 * size:]
        # linear + gate*(nonlinear - linear) == gate*nonlinear + (1-gate)*linear
        x = linear + gate * (nonlinear - linear)
    o_ref[...] = x.astype(o_ref.dtype)


def fuse_highway_params(wg, bg, wn, bn, wl, bl, weight_dtype=jnp.bfloat16):
    """Concatenate per-branch (in, out) weights into [L, S, 3S] / [L, 3S].

    Branch order along the output axis is [gate, nonlinear, linear] and must
    match the slicing order in highway_kernel.
    """
    w = jnp.concatenate([wg, wn, wl], axis=-1).astype(weight_dtype)
    b = jnp.concatenate([bg, bn, bl], axis=-1).astype(jnp.float32)
    return w, b


def _pick_tile_b(B):
    # Largest row tile (multiple of 8 sublanes) that still leaves >= 2 grid
    # steps, so the "parallel" axis can be split across v7x's two TensorCores.
    for t in (1024, 512, 256, 128, 64, 32, 16, 8):
        if B % t == 0 and B // t >= 2:
            return t
    return B


def highway(x, w, b, *, tile_b=None):
    """x: [B, S]; w: [L, S, 3S] (fused, (in, out) layout); b: [L, 3S]."""
    B, S = x.shape
    L, S_in, S_out = w.shape
    assert S_in == S and S_out == 3 * S and b.shape == (L, 3 * S)
    if tile_b is None:
        tile_b = _pick_tile_b(B)
    assert B % tile_b == 0

    kernel = functools.partial(highway_kernel, num_layers=L, size=S)

    nbytes = lambda a: a.size * a.dtype.itemsize
    cost = pl.CostEstimate(
        flops=2 * B * S * (3 * S) * L,
        transcendentals=B * S * L,                   # sigmoid per layer
        bytes_accessed=2 * nbytes(x) + nbytes(w) + nbytes(b),
    )

    return pl.pallas_call(
        kernel,
        out_shape=jax.ShapeDtypeStruct((B, S), x.dtype),
        grid_spec=pltpu.PrefetchScalarGridSpec(
            num_scalar_prefetch=0,
            grid=(B // tile_b,),
            in_specs=[
                pl.BlockSpec((tile_b, S), lambda i: (i, 0)),
                pl.BlockSpec((L, S, 3 * S), lambda i: (0, 0, 0)),  # resident
                pl.BlockSpec((L, 3 * S), lambda i: (0, 0)),        # resident
            ],
            out_specs=pl.BlockSpec((tile_b, S), lambda i: (i, 0)),
        ),
        compiler_params=pltpu.CompilerParams(
            dimension_semantics=("parallel",)),
        cost_estimate=cost,
    )(x, w, b)


def highway_ref(x, wg, bg, wn, bn, wl, bl):
    """Pure-JAX f32 reference mirroring the PyTorch forward."""
    x = x.astype(jnp.float32)
    hp = jax.lax.Precision.HIGHEST
    for layer in range(wg.shape[0]):
        gate = jax.nn.sigmoid(jnp.dot(x, wg[layer], precision=hp) + bg[layer])
        nonlinear = jax.nn.relu(jnp.dot(x, wn[layer], precision=hp) + bn[layer])
        linear = jnp.dot(x, wl[layer], precision=hp) + bl[layer]
        x = gate * nonlinear + (1.0 - gate) * linear
    return x


if __name__ == "__main__":
    # Highway(size=128, num_layers=2, f=relu); x: [batch=128, size=128]
    # (128 rows = flattened batch*seq; gives 2 "parallel" grid steps of 64 rows.)
    size = 128
    num_layers = 2
    batch = 128

    key = jax.random.PRNGKey(0)
    keys = jax.random.split(key, 1 + 6 * num_layers)
    x = jax.random.normal(keys[0], (batch, size), dtype=jnp.float32)

    # Deterministic PyTorch-style Linear init: U(-1/sqrt(size), 1/sqrt(size)).
    bound = 1.0 / (size ** 0.5)

    def init_linear(kw, kb):
        # nn.Linear weight is (out, in); store transposed (in, out) for x @ W.
        w = jax.random.uniform(kw, (size, size), jnp.float32, -bound, bound).T
        b = jax.random.uniform(kb, (size,), jnp.float32, -bound, bound)
        return w, b

    wg_l, bg_l, wn_l, bn_l, wl_l, bl_l = [], [], [], [], [], []
    ki = 1
    for _ in range(num_layers):
        w_, b_ = init_linear(keys[ki], keys[ki + 1]); ki += 2
        wn_l.append(w_); bn_l.append(b_)          # nonlinear branch
        w_, b_ = init_linear(keys[ki], keys[ki + 1]); ki += 2
        wl_l.append(w_); bl_l.append(b_)          # linear branch
        w_, b_ = init_linear(keys[ki], keys[ki + 1]); ki += 2
        wg_l.append(w_); bg_l.append(b_)          # gate branch

    wg = jnp.stack(wg_l); bg = jnp.stack(bg_l)
    wn = jnp.stack(wn_l); bn = jnp.stack(bn_l)
    wl = jnp.stack(wl_l); bl = jnp.stack(bl_l)

    # Host-side fusion: [L, S, 3S] bf16 weights, [L, 3S] f32 biases.
    w_fused, b_fused = fuse_highway_params(wg, bg, wn, bn, wl, bl)

    out = jax.block_until_ready(highway(x, w_fused, b_fused))

    ref = highway_ref(x, wg, bg, wn, bn, wl, bl)
    assert out.shape == ref.shape
    # bf16 weights / operands on the MXU (f32 accumulation) vs. full-f32 ref.
    assert jnp.allclose(out, ref, atol=3e-2, rtol=3e-2), "mismatch vs reference"

    print("KERNEL_OK")
</pallas_src>

<mosaic_0001>
module attributes {stable_mosaic.version = 11 : i64} {
  func.func @highway_kernel(%arg0: i32, %arg1: memref<64x128xf32, #tpu.memory_space<vmem>>, %arg2: memref<2x128x384xbf16, #tpu.memory_space<vmem>>, %arg3: memref<2x384xf32, #tpu.memory_space<vmem>>, %arg4: memref<64x128xf32, #tpu.memory_space<vmem>>) attributes {dimension_semantics = [#tpu.dimension_semantics<parallel>], iteration_bounds = array<i64: 2>, scalar_prefetch = 0 : i64, scratch_operands = 0 : i64, tpu.core_type = #tpu.core_type<tc>, window_params = [{transform_indices = @transform_0, window_bounds = array<i64: 64, 128>}, {pipeline_mode = #tpu.pipeline_mode<synchronous>, transform_indices = @transform_1, window_bounds = array<i64: 2, 128, 384>}, {pipeline_mode = #tpu.pipeline_mode<synchronous>, transform_indices = @transform_2, window_bounds = array<i64: 2, 384>}, {transform_indices = @transform_3, window_bounds = array<i64: 64, 128>}]} {
    %c0 = arith.constant 0 : index
    %c0_0 = arith.constant 0 : index
    %0 = vector.load %arg1[%c0, %c0_0] : memref<64x128xf32, #tpu.memory_space<vmem>>, vector<64x128xf32>
    %c0_1 = arith.constant 0 : index
    %c0_2 = arith.constant 0 : index
    %c0_3 = arith.constant 0 : index
    %1 = vector.load %arg2[%c0_1, %c0_2, %c0_3] : memref<2x128x384xbf16, #tpu.memory_space<vmem>>, vector<1x128x384xbf16>
    %2 = vector.shape_cast %1 : vector<1x128x384xbf16> to vector<128x384xbf16>
    %c0_4 = arith.constant 0 : index
    %c0_5 = arith.constant 0 : index
    %3 = vector.load %arg3[%c0_4, %c0_5] : memref<2x384xf32, #tpu.memory_space<vmem>>, vector<1x384xf32>
    %4 = vector.shape_cast %3 : vector<1x384xf32> to vector<384xf32>
    %5 = vector.shape_cast %4 : vector<384xf32> to vector<1x384xf32>
    %6 = arith.truncf %0 : vector<64x128xf32> to vector<64x128xbf16>
    %cst = arith.constant dense<0.000000e+00> : vector<64x384xf32>
    %7 = tpu.matmul %6, %2, %cst {dimension_numbers = #tpu.dot_dimension_numbers<[1], [0], [0], [1], [0, 0, 1, 1], [], []>} : vector<64x128xbf16>, vector<128x384xbf16>, vector<64x384xf32> -> vector<64x384xf32>
    %8 = vector.broadcast %5 : vector<1x384xf32> to vector<64x384xf32>
    %9 = arith.addf %7, %8 : vector<64x384xf32>
    %10 = vector.extract_strided_slice %9 {offsets = [0, 0], sizes = [64, 128], strides = [1, 1]} : vector<64x384xf32> to vector<64x128xf32>
    %11 = arith.negf %10 : vector<64x128xf32>
    %12 = math.exp %11 : vector<64x128xf32>
    %cst_6 = arith.constant 1.000000e+00 : f32
    %13 = vector.broadcast %cst_6 : f32 to vector<64x128xf32>
    %14 = arith.addf %13, %12 : vector<64x128xf32>
    %15 = arith.divf %13, %14 : vector<64x128xf32>
    %16 = vector.extract_strided_slice %9 {offsets = [0, 128], sizes = [64, 128], strides = [1, 1]} : vector<64x384xf32> to vector<64x128xf32>
    %cst_7 = arith.constant 0.000000e+00 : f32
    %17 = vector.broadcast %cst_7 : f32 to vector<64x128xf32>
    %18 = arith.maximumf %16, %17 : vector<64x128xf32>
    %19 = vector.extract_strided_slice %9 {offsets = [0, 256], sizes = [64, 128], strides = [1, 1]} : vector<64x384xf32> to vector<64x128xf32>
    %20 = arith.subf %18, %19 : vector<64x128xf32>
    %21 = arith.mulf %15, %20 : vector<64x128xf32>
    %22 = arith.addf %19, %21 : vector<64x128xf32>
    %c1 = arith.constant 1 : index
    %c0_8 = arith.constant 0 : index
    %c0_9 = arith.constant 0 : index
    %23 = vector.load %arg2[%c1, %c0_8, %c0_9] : memref<2x128x384xbf16, #tpu.memory_space<vmem>>, vector<1x128x384xbf16>
    %24 = vector.shape_cast %23 : vector<1x128x384xbf16> to vector<128x384xbf16>
    %c1_10 = arith.constant 1 : index
    %c0_11 = arith.constant 0 : index
    %25 = vector.load %arg3[%c1_10, %c0_11] : memref<2x384xf32, #tpu.memory_space<vmem>>, vector<1x384xf32>
    %26 = vector.shape_cast %25 : vector<1x384xf32> to vector<384xf32>
    %27 = vector.shape_cast %26 : vector<384xf32> to vector<1x384xf32>
    %28 = arith.truncf %22 : vector<64x128xf32> to vector<64x128xbf16>
    %cst_12 = arith.constant dense<0.000000e+00> : vector<64x384xf32>
    %29 = tpu.matmul %28, %24, %cst_12 {dimension_numbers = #tpu.dot_dimension_numbers<[1], [0], [0], [1], [0, 0, 1, 1], [], []>} : vector<64x128xbf16>, vector<128x384xbf16>, vector<64x384xf32> -> vector<64x384xf32>
    %30 = vector.broadcast %27 : vector<1x384xf32> to vector<64x384xf32>
    %31 = arith.addf %29, %30 : vector<64x384xf32>
    %32 = vector.extract_strided_slice %31 {offsets = [0, 0], sizes = [64, 128], strides = [1, 1]} : vector<64x384xf32> to vector<64x128xf32>
    %33 = arith.negf %32 : vector<64x128xf32>
    %34 = math.exp %33 : vector<64x128xf32>
    %cst_13 = arith.constant 1.000000e+00 : f32
    %35 = vector.broadcast %cst_13 : f32 to vector<64x128xf32>
    %36 = arith.addf %35, %34 : vector<64x128xf32>
    %37 = arith.divf %35, %36 : vector<64x128xf32>
    %38 = vector.extract_strided_slice %31 {offsets = [0, 128], sizes = [64, 128], strides = [1, 1]} : vector<64x384xf32> to vector<64x128xf32>
    %cst_14 = arith.constant 0.000000e+00 : f32
    %39 = vector.broadcast %cst_14 : f32 to vector<64x128xf32>
    %40 = arith.maximumf %38, %39 : vector<64x128xf32>
    %41 = vector.extract_strided_slice %31 {offsets = [0, 256], sizes = [64, 128], strides = [1, 1]} : vector<64x384xf32> to vector<64x128xf32>
    %42 = arith.subf %40, %41 : vector<64x128xf32>
    %43 = arith.mulf %37, %42 : vector<64x128xf32>
    %44 = arith.addf %41, %43 : vector<64x128xf32>
    %c0_15 = arith.constant 0 : index
    %c0_16 = arith.constant 0 : index
    %45 = vector.load %arg4[%c0_15, %c0_16] : memref<64x128xf32, #tpu.memory_space<vmem>>, vector<64x128xf32>
    tpu.vector_store %arg4[%c0_15, %c0_16], %44 {strides = array<i32>} : memref<64x128xf32, #tpu.memory_space<vmem>>, vector<64x128xf32>,
    return
  }
  func.func @transform_0(%arg0: i32) -> (i32, i32) {
    %c0_i32 = arith.constant 0 : i32
    %c0_i32_0 = arith.constant 0 : i32
    return %arg0, %c0_i32 : i32, i32
  }
  func.func @transform_1(%arg0: i32) -> (i32, i32, i32) {
    %c0_i32 = arith.constant 0 : i32
    %c0_i32_0 = arith.constant 0 : i32
    %c0_i32_1 = arith.constant 0 : i32
    %c0_i32_2 = arith.constant 0 : i32
    return %c0_i32, %c0_i32_0, %c0_i32_1 : i32, i32, i32
  }
  func.func @transform_2(%arg0: i32) -> (i32, i32) {
    %c0_i32 = arith.constant 0 : i32
    %c0_i32_0 = arith.constant 0 : i32
    %c0_i32_1 = arith.constant 0 : i32
    return %c0_i32, %c0_i32_0 : i32, i32
  }
  func.func @transform_3(%arg0: i32) -> (i32, i32) {
    %c0_i32 = arith.constant 0 : i32
    %c0_i32_0 = arith.constant 0 : i32
    return %arg0, %c0_i32 : i32, i32
  }
}

</mosaic_0001>

<bundles_post_ra>
// kernel: tpu_custom_call.1
= control target key start
LH: loop header
LB: loop body
LE: loop exit
PB: predicated region body
PF: predicated region fallthrough
CT: control target
= control target key end

     0   :  { %8 = vsyncpa [#allocation3], 0  ;;  %s2240_s0 = inlined_call_operand.hbm [shape: f32[128,128], index: 0, kind: input, shape index: {}]   ;;  %s2241_s1 = inlined_call_operand.hbm [shape: bf16[2,128,384], index: 1, kind: input, shape index: {}]   ;;  %s2242_s2 = inlined_call_operand.hbm [shape: f32[2,384], index: 2, kind: input, shape index: {}]   ;;  %s2243_s3 = inlined_call_operand.hbm [shape: f32[128,128], index: 3, kind: output, shape index: {}]  }
   0x1   :  { %10 = vsyncpa [#allocation3 + $0x1], 0 }
   0x2   :  { %11 = vsyncpa [#allocation6], 0 }
   0x3   :  { %12 = vsyncpa [#allocation4], 0 }
   0x4   :  { %14 = vsyncpa [#allocation4 + $0x1], 0  ;;  %s1855_s12 = smov 0   ;;  %s1857_s13 = smov 0  }
   0x5   :  { %s1859_s14 = smov 0   ;;  %s1861_s15 = smov 0  }
   0x6 LB: > { %s1876_s16 = sadd.s32 4294967295, %s1825_s15   ;;  %s1236_s17 = sadd.s32 4294967294, %s1825_s15   ;;  %s1825_s15 = sphi %s1861_s15, %s2263_s15   ;;  %s1821_s14 = sphi %s1859_s14, %s2262_s14   ;;  %s1817_s13 = sphi %s1857_s13, %s2261_s13   ;;  %s1813_s12 = sphi %s1855_s12, %s2260_s12  }
   0x7   : > { %p40_p0 = scmp.ne.s32.totalorder %s1817_s13, %s1813_s12  ;;  %p41_p1 = scmp.eq.s32.totalorder %s1876_s16, 0 }
   0x8   : > { %p106_p2 = scmp.eq.s32.totalorder %s1876_s16, 1  ;;  %p112_p3 = scmp.eq.s32.totalorder %s1236_s17, 1 }
   0x9   : > { %p1885_p4 = por %p41_p1, %p40_p0  ;;  %p1237_p5 = scmp.ge.s32.totalorder %s1825_s15, 1 }
   0xa   : > { %p1890_p6 = por %p112_p3, %p40_p0  ;;  %p119_p7 = scmp.lt.s32.totalorder %s1825_s15, 3 }
   0xb   : > { %s130_s22 = sshll.u32 %s2241_s1, 4  ;;  %s1827_s24 = smov [#allocation5]   ;;  %s131_s22 = int_to_ptr.hbm [resolvable:$true] %s130_s22 }
   0xc   : > { %p1898_p8 = pnand %p1237_p5, %p119_p7  ;;  %s132_s25 = sshll.u32 %s1827_s24, 4  ;;  %s133_s25 = int_to_ptr.vmem [resolvable:$true] %s132_s25 }
   0xd   : > { %s145_s28 = sshll.u32 %s2242_s2, 4  ;;  %s1828_s29 = smov 192   ;;  %s146_s28 = int_to_ptr.hbm [resolvable:$true] %s145_s28 }
   0xe   : > { %p1540_p9 = pneg %p1898_p8  ;;  %s1829_s30 = smov 12  }
   0xf   : > { %s1830_s4 = smov [#allocation7]   ;;  %s1911_s6 = sadd.s32 1, %s1825_s15  }
  0x10   : > { %p1541_p10 = pnand %p1540_p9, %p41_p1  ;;  %s147_s5 = sshll.u32 %s1830_s4, 4  ;;  %s148_s5 = int_to_ptr.vmem [resolvable:$true] %s147_s5 }
  0x11   : > { %s27_s7 = sadd.s32 1, %s1821_s14  ;;  %s24_s8 = ssub.s32 %s1825_s15, %s1911_s6 }
  0x12   : > { %1543 = dma.hbm_to_vmem [thread:$0]  (!%p1541_p10), %s131_s22, 6144, %s133_s25, [#allocation6], %s1828_s29, %s1828_s29, %s1829_s30  }
  0x13   : > { %1546 = dma.hbm_to_vmem [thread:$0]  (!%p1541_p10), %s146_s28, 96, %s148_s5, [#allocation6]  }
  0x14   : > { %p34_p12 = scmp.ne.s32.totalorder %s1821_s14, %s1817_s13  ;;  %p25_p13 = scmp.eq.s32.totalorder %s24_s8, 0 }
  0x15   : > { %p35_p0 = scmp.eq.s32.totalorder %s1825_s15, 0  ;;  %p1557_p5 = scmp.lt.s32.totalorder %s1825_s15, 2 }
  0x16   : > { %p1921_p3 = por %p106_p2, %p34_p12  ;;  %s158_s11 = sand.u32 1, %s1821_s14  }
  0x17   : > { %s1927_s10 = scalar_select %p25_p13, %s1821_s14, %s27_s7  }
  0x18   : > { %p36_p7 = por %p35_p0, %p34_p12  ;;  %s1241_s17 = sshll.u32 %s158_s11, 6 }
  0x19   : > { %s1462_s20 = sshll.u32 %s1825_s15, 6  ;;  %s162_s25 = scalar_lea.vmem [#allocation2], %s1241_s17 }
  0x1a   : > { %s167_s24 = scalar_lea.hbm %s2240_s0, %s1462_s20  ;;  %s170_s26 = sshll.u32 %s162_s25, 4  ;;  %s171_s26 = int_to_ptr.vmem [resolvable:$true] %s170_s26 }
  0x1b   : > { %s168_s27 = sshll.u32 %s167_s24, 4  ;;  %p1934_p2 = pnand %p1557_p5, %p36_p7  ;;  %s169_s27 = int_to_ptr.hbm [resolvable:$true] %s168_s27 }
  0x1c   : > { %s159_s29 = scalar_lea.sflag [#allocation3], %s158_s11  ;;  %s1725_s30 = sshra.s32 %s169_s27, 4  ;;  %s1726_s30 = int_to_ptr.hbm [resolvable:$true] %s1725_s30 }
  0x1d   : > { %s1727_s4 = scalar_lea.hbm %s1726_s30, 64  ;;  %p1729_p10 = pneg %p1934_p2 }
  0x1e   : > { %p1728_p9 = scmp.ne.s32.totalorder %s1726_s30, %s1727_s4  ;;  %s1732_s8 = scalar_lea.hbm %s2240_s0, 128 }
  0x1f   : > { %p1733_p0 = scmp.lt.s32.totalorder %s1726_s30, %s2240_s0  ;;  %p1734_p5 = scmp.lt.s32.totalorder %s1732_s8, %s1727_s4 }
  0x20   : > { %p1730_p12 = pnand %p1729_p10, %p1728_p9 }
  0x21   : > { %p1735_p7 = por %p1734_p5, %p1733_p0 }
  0x22   : > { %p1731_p13 = pneg %p1730_p12 }
  0x24   : > { %p1736_p11 = pnand %p1735_p7, %p1731_p13 }
  0x26   : > { %1739 = shalt.err (!%p1736_p11)
}
  0x27   : > { %s1831_s11 = smov 128   ;;  %s1832_s21 = smov 8  }
  0x28   : > { %1550 = dma.hbm_to_vmem [thread:$0]  (!%p1934_p2), %s169_s27, 1024, %s171_s26, %s159_s29, %s1831_s11, %s1831_s11, %s1832_s21  }
  0x29   : > { %182 = sbr.rel (%p1898_p8) target bundleno = 491 (0x1eb), region = 32  ;;  %s1951_s22 = sand.u32 (!%p1898_p8), 1, %s1817_s13  }
  0x2a   : > { %s1245_s24 = sshll.u32 (!%p1898_p8), %s1951_s22, 6  ;;  %s185_s25 = scalar_lea.sflag (!%p1898_p8), [#allocation3], %s1951_s22 }
  0x2b   : > { %s1957_s30 = scalar_lea.vmem (!%p1898_p8), [#allocation2], %s1245_s24 }
  0x2e   : > { %1800 = dma.done.wait (%p1885_p4), %s185_s25, 1024  }
  0x2f   : > { %1802 = vsyncadd (%p1885_p4), %s185_s25, 4294966272 }
  0x30   : > { %1804 = dma.done.wait (%p41_p1), [#allocation6], 6240  }
  0x31   : > { %1806 = vsyncadd (%p41_p1), [#allocation6], 4294961056  ;;  %v1335_v0 = vld [vmem:[#allocation5 + $0xa8] sm:$0xf]  ;;  %v1485_v1 = vld [vmem:[#allocation5 + $0xb0] sm:$0xf0] }
  0x32   : > { %v1323_v2 = vld [vmem:[#allocation5 + $0x90] sm:$0xf]  ;;  %v1336_v3 = vor.u32 %v1485_v1, %v1335_v0  ;;  %v1482_v4 = vld [vmem:[#allocation5 + $0x98] sm:$0xf0]  ;;  %v1311_v6 = vld [vmem:[#allocation5 + $0x78] sm:$0xf] }
  0x33   : > { %v1324_v5 = vor.u32 %v1482_v4, %v1323_v2  ;;  %v1479_v7 = vld [vmem:[#allocation5 + $0x80] sm:$0xf0]  ;;  %v1484_v8 = vld [vmem:[#allocation5 + $0xac] sm:$0xf]  ;;  %v1337_v9 = vld [vmem:[#allocation5 + $0xb4] sm:$0xf0] }
  0x34   : > { %404 = vmatpush.bf16.msra.mxu0 %v1336_v3  ;;  %1512 = vmatpush.bf16.msra.mxu2 %v1336_v3  ;;  %v1340_v10 = vor.u32 %v1484_v8, %v1337_v9  ;;  %v1312_v11 = vor.u32 %v1479_v7, %v1311_v6  ;;  %v1299_v12 = vld [vmem:[#allocation5 + $0x60] sm:$0xf]  ;;  %v1476_v13 = vld [vmem:[#allocation5 + $0x68] sm:$0xf0]  ;;  %v1481_v14 = vld [vmem:[#allocation5 + $0x94] sm:$0xf] }
  0x35   : > { %v1325_v15 = vld [vmem:[#allocation5 + $0x9c] sm:$0xf0]  ;;  %v1478_v17 = vld [vmem:[#allocation5 + $0x7c] sm:$0xf]  ;;  %v1313_v18 = vld [vmem:[#allocation5 + $0x84] sm:$0xf0]  ;;  %v1300_v19 = vor.u32 %v1476_v13, %v1299_v12 }
  0x36   : > { %433 = vmatpush.bf16.msra.mxu1 %v1340_v10  ;;  %1520 = vmatpush.bf16.msra.mxu3 %v1340_v10  ;;  %v1328_v16 = vor.u32 %v1481_v14, %v1325_v15  ;;  %v1287_v20 = vld [vmem:[#allocation5 + $0x48] sm:$0xf]  ;;  %v1473_v21 = vld [vmem:[#allocation5 + $0x50] sm:$0xf0]  ;;  %v1316_v22 = vor.u32 %v1478_v17, %v1313_v18  ;;  %v1475_v23 = vld [vmem:[#allocation5 + $0x64] sm:$0xf] }
  0x37   : > { %v1301_v24 = vld [vmem:[#allocation5 + $0x6c] sm:$0xf0]  ;;  %v1288_v25 = vor.u32 %v1473_v21, %v1287_v20  ;;  %v1470_v27 = vld [vmem:[#allocation5 + $0x38] sm:$0xf0]  ;;  %v1472_v29 = vld [vmem:[#allocation5 + $0x4c] sm:$0xf] }
  0x38   : > { %405 = vmatpush.bf16.msra.mxu0 %v1324_v5  ;;  %1513 = vmatpush.bf16.msra.mxu2 %v1324_v5  ;;  %v1275_v26 = vld [vmem:[#allocation5 + $0x30] sm:$0xf]  ;;  %v1304_v28 = vor.u32 %v1475_v23, %v1301_v24  ;;  %v1289_v30 = vld [vmem:[#allocation5 + $0x54] sm:$0xf0]  ;;  %v1467_v33 = vld [vmem:[#allocation5 + $0x20] sm:$0xf0] }
  0x39   : > { %v1276_v31 = vor.u32 %v1470_v27, %v1275_v26  ;;  %v1263_v32 = vld [vmem:[#allocation5 + $0x18] sm:$0xf]  ;;  %v1292_v34 = vor.u32 %v1472_v29, %v1289_v30  ;;  %v1469_v35 = vld [vmem:[#allocation5 + $0x34] sm:$0xf]  ;;  %v1277_v36 = vld [vmem:[#allocation5 + $0x3c] sm:$0xf0] }
  0x3a   : > { %434 = vmatpush.bf16.msra.mxu1 %v1328_v16  ;;  %1521 = vmatpush.bf16.msra.mxu3 %v1328_v16  ;;  %v1264_v37 = vor.u32 %v1467_v33, %v1263_v32  ;;  %v1251_v38 = vld [vmem:[#allocation5] sm:$0xf]  ;;  %v1464_v39 = vld [vmem:[#allocation5 + $0x8] sm:$0xf0]  ;;  %v1343_v40 = vld [vmem:[#allocation5 + $0xb0] sm:$0xf]  ;;  %v1280_v41 = vor.u32 %v1469_v35, %v1277_v36 }
  0x3b   : > { %v1486_v42 = vld [vmem:[#allocation5 + $0xb8] sm:$0xf0]  ;;  %v1265_v44 = vld [vmem:[#allocation5 + $0x24] sm:$0xf0]  ;;  %v224_v45 = vld [vmem:[%s1957_s30] sm:$0xff]  ;;  %v1252_v46 = vor.u32 %v1464_v39, %v1251_v38  ;;  %s2176_s18 = scalar_lea.vmem [#allocation8], %s1245_s24 }
  0x3c   : > { %406 = vmatpush.bf16.msra.mxu0 %v1312_v11  ;;  %1514 = vmatpush.bf16.msra.mxu2 %v1312_v11  ;;  %v1466_v43 = vld [vmem:[#allocation5 + $0x1c] sm:$0xf]  ;;  %v225_v47 = vld [vmem:[%s1957_s30 + $0x8] sm:$0xff]  ;;  %v228_v48 = vld [vmem:[%s1957_s30 + $0x20] sm:$0xff]  ;;  %v1344_v50 = vor.u32 %v1486_v42, %v1343_v40  ;;  %s1511_s23 = sshll.u32 %s1876_s16, 6  ;;  %s1141_s16 = sshll.u32 %s2176_s18, 4  ;;  %s1142_s16 = int_to_ptr.vmem [resolvable:$true] %s1141_s16 }
  0x3d   : > { %v229_v49 = vld [vmem:[%s1957_s30 + $0x28] sm:$0xff]  ;;  %v1331_v51 = vld [vmem:[#allocation5 + $0x98] sm:$0xf]  ;;  %v1268_v52 = vor.u32 %v1466_v43, %v1265_v44  ;;  %v1483_v53 = vld [vmem:[#allocation5 + $0xa0] sm:$0xf0]  ;;  %v265_v56 = vpack.c.bf16 %v225_v47, %v224_v45  ;;  %s1140_s28 = scalar_lea.hbm %s2243_s3, %s1511_s23  ;;  %s1129_s4 = scalar_lea.sflag [#allocation4], %s1951_s22 }
  0x3e   : > { %435 = vmatpush.bf16.msra.mxu1 %v1316_v22  ;;  %1522 = vmatpush.bf16.msra.mxu3 %v1316_v22  ;;  %v1463_v54 = vld [vmem:[#allocation5 + $0x4] sm:$0xf]  ;;  %v1253_v55 = vld [vmem:[#allocation5 + $0xc] sm:$0xf0]  ;;  %v267_v57 = vpack.c.bf16 %v229_v49, %v228_v48  ;;  %v1332_v58 = vor.u32 %v1483_v53, %v1331_v51  ;;  %v1319_v60 = vld [vmem:[#allocation5 + $0x80] sm:$0xf] }
  0x3f   : > { %v1256_v59 = vor.u32 %v1463_v54, %v1253_v55  ;;  %v1480_v61 = vld [vmem:[#allocation5 + $0x88] sm:$0xf0]  ;;  %v1307_v63 = vld [vmem:[#allocation5 + $0x68] sm:$0xf]  ;;  %v1477_v0 = vld [vmem:[#allocation5 + $0x70] sm:$0xf0] }
  0x40   : > { %407 = vmatpush.bf16.msra.mxu0 %v1300_v19  ;;  %1515 = vmatpush.bf16.msra.mxu2 %v1300_v19  ;;  %v1320_v62 = vor.u32 %v1480_v61, %v1319_v60  ;;  %v1308_v1 = vor.u32 %v1477_v0, %v1307_v63  ;;  %v1295_v2 = vld [vmem:[#allocation5 + $0x50] sm:$0xf]  ;;  %v1474_v3 = vld [vmem:[#allocation5 + $0x58] sm:$0xf0]  ;;  %v1283_v9 = vld [vmem:[#allocation5 + $0x38] sm:$0xf] }
  0x41   : > { %v226_v4 = vld [vmem:[%s1957_s30 + $0x10] sm:$0xff]  ;;  %v227_v5 = vld [vmem:[%s1957_s30 + $0x18] sm:$0xff]  ;;  %v1296_v8 = vor.u32 %v1474_v3, %v1295_v2  ;;  %v1471_v10 = vld [vmem:[#allocation5 + $0x40] sm:$0xf0]  ;;  %s1143_s29 = sshll.u32 %s1140_s28, 4  ;;  %s1775_s20 = scalar_lea.hbm %s2243_s3, 128  ;;  %s1144_s29 = int_to_ptr.hbm [resolvable:$true] %s1143_s29 }
  0x42   : > { %436 = vmatpush.bf16.msra.mxu1 %v1304_v28  ;;  %1523 = vmatpush.bf16.msra.mxu3 %v1304_v28  ;;  %v230_v6 = vld [vmem:[%s1957_s30 + $0x30] sm:$0xff]  ;;  %v231_v7 = vld [vmem:[%s1957_s30 + $0x38] sm:$0xff]  ;;  %v266_v11 = vpack.c.bf16 %v227_v5, %v226_v4  ;;  %v1284_v13 = vor.u32 %v1471_v10, %v1283_v9  ;;  %v1271_v14 = vld [vmem:[#allocation5 + $0x20] sm:$0xf]  ;;  %s1769_s5 = sshra.s32 %s1144_s29, 4  ;;  %s1770_s5 = int_to_ptr.hbm [resolvable:$true] %s1769_s5 }
  0x43   : > { %v268_v12 = vpack.c.bf16 %v231_v7, %v230_v6  ;;  %v1468_v15 = vld [vmem:[#allocation5 + $0x28] sm:$0xf0]  ;;  %v1259_v17 = vld [vmem:[#allocation5 + $0x8] sm:$0xf]  ;;  %v1465_v18 = vld [vmem:[#allocation5 + $0x10] sm:$0xf0]  ;;  %p1776_p11 = scmp.lt.s32.totalorder %s1770_s5, %s2243_s3 }
  0x44   : > { %408 = vmatpush.bf16.msra.mxu0 %v1288_v25  ;;  %1516 = vmatpush.bf16.msra.mxu2 %v1288_v25  ;;  %v1272_v16 = vor.u32 %v1468_v15, %v1271_v14  ;;  %v1260_v19 = vor.u32 %v1465_v18, %v1259_v17  ;;  %v1439_v20 = vld [vmem:[#allocation5 + $0x168] sm:$0xf]  ;;  %v1509_v21 = vld [vmem:[#allocation5 + $0x170] sm:$0xf0]  ;;  %v1508_v22 = vld [vmem:[#allocation5 + $0x16c] sm:$0xf] }
  0x45   : > { %v1440_v23 = vor.u32 %v1509_v21, %v1439_v20  ;;  %v1441_v24 = vld [vmem:[#allocation5 + $0x174] sm:$0xf0]  ;;  %v1447_v25 = vld [vmem:[#allocation5 + $0x170] sm:$0xf]  ;;  %v1510_v26 = vld [vmem:[#allocation5 + $0x178] sm:$0xf0] }
  0x46   : > { %437 = vmatpush.bf16.msra.mxu1 %v1292_v34  ;;  %1524 = vmatpush.bf16.msra.mxu3 %v1292_v34  ;;  %v1444_v27 = vor.u32 %v1508_v22, %v1441_v24  ;;  %v1448_v28 = vor.u32 %v1510_v26, %v1447_v25  ;;  %v1975_v29 = vld [vmem:[#allocation7] ss:$2 sm:$0x7]  ;;  %v1427_v30 = vld [vmem:[#allocation5 + $0x150] sm:$0xf]  ;;  %s1771_s7 = scalar_lea.hbm %s1770_s5, 64 }
  0x47   : > { %v1505_v32 = vld [vmem:[#allocation5 + $0x154] sm:$0xf]  ;;  %v1429_v34 = vld [vmem:[#allocation5 + $0x15c] sm:$0xf0]  ;;  %v1435_v35 = vld [vmem:[#allocation5 + $0x158] sm:$0xf]  ;;  %p1772_p1 = scmp.ne.s32.totalorder %s1770_s5, %s1771_s7  ;;  %p1777_p2 = scmp.lt.s32.totalorder %s1775_s20, %s1771_s7 }
  0x48   : > { %409 = vmatpush.bf16.msra.mxu0 %v1276_v31  ;;  %1517 = vmatpush.bf16.msra.mxu2 %v1276_v31  ;;  %v1506_v31 = vld [vmem:[#allocation5 + $0x158] sm:$0xf0]  ;;  %v1507_v36 = vld [vmem:[#allocation5 + $0x160] sm:$0xf0]  ;;  %v1432_v38 = vor.u32 %v1505_v32, %v1429_v34  ;;  %v1415_v40 = vld [vmem:[#allocation5 + $0x138] sm:$0xf] }
  0x49   : > { %v1428_v33 = vor.u32 %v1506_v31, %v1427_v30  ;;  %v1436_v39 = vor.u32 %v1507_v36, %v1435_v35  ;;  %v1502_v42 = vld [vmem:[#allocation5 + $0x13c] sm:$0xf]  ;;  %v1417_v45 = vld [vmem:[#allocation5 + $0x144] sm:$0xf0]  ;;  %v1504_v47 = vld [vmem:[#allocation5 + $0x148] sm:$0xf0]  ;;  %p1773_p4 = pnand %p1772_p1, %p1921_p3  ;;  %p1778_p9 = por %p1777_p2, %p1776_p11 }
  0x4a   : > { %438 = vmatpush.bf16.msra.mxu1 %v1280_v41  ;;  %1525 = vmatpush.bf16.msra.mxu3 %v1280_v41  ;;  %v1503_v41 = vld [vmem:[#allocation5 + $0x140] sm:$0xf0]  ;;  %v1420_v49 = vor.u32 %v1502_v42, %v1417_v45  ;;  %v1500_v53 = vld [vmem:[#allocation5 + $0x128] sm:$0xf0]  ;;  %v1405_v55 = vld [vmem:[#allocation5 + $0x12c] sm:$0xf0] }
  0x4b   : > { %v1416_v44 = vor.u32 %v1503_v41, %v1415_v40  ;;  %v1499_v54 = vld [vmem:[#allocation5 + $0x124] sm:$0xf]  ;;  %v1497_v63 = vld [vmem:[#allocation5 + $0x110] sm:$0xf0]  ;;  %v1496_v0 = vld [vmem:[#allocation5 + $0x10c] sm:$0xf]  ;;  %p1774_p8 = pneg %p1773_p4 }
  0x4c   : > { %410 = vmatpush.bf16.msra.mxu0 %v1264_v37  ;;  %1518 = vmatpush.bf16.msra.mxu2 %v1264_v37  ;;  %v1978_v37 = vperm.slane %v1975_v29, 0  ;;  %v1393_v3 = vld [vmem:[#allocation5 + $0x114] sm:$0xf0]  ;;  %v1399_v4 = vld [vmem:[#allocation5 + $0x110] sm:$0xf] }
  0x4d   : > { %v1396_v6 = vor.u32 %v1496_v0, %v1393_v3  ;;  %v1498_v7 = vld [vmem:[#allocation5 + $0x118] sm:$0xf0]  ;;  %v1379_v10 = vld [vmem:[#allocation5 + $0xf0] sm:$0xf]  ;;  %v1381_v14 = vld [vmem:[#allocation5 + $0xfc] sm:$0xf0]  ;;  %p1779_p10 = pnand %p1778_p9, %p1774_p8 }
  0x4e   : > { %439 = vmatpush.bf16.msra.mxu1 %v1268_v52  ;;  %1526 = vmatpush.bf16.msra.mxu3 %v1268_v52  ;;  %v1403_v52 = vld [vmem:[#allocation5 + $0x120] sm:$0xf]  ;;  %v1387_v17 = vld [vmem:[#allocation5 + $0xf8] sm:$0xf]  ;;  %v1495_v18 = vld [vmem:[#allocation5 + $0x100] sm:$0xf0] }
  0x4f   : > { %v1388_v20 = vor.u32 %v1495_v18, %v1387_v17  ;;  %v1367_v21 = vld [vmem:[#allocation5 + $0xd8] sm:$0xf]  ;;  %v1491_v22 = vld [vmem:[#allocation5 + $0xe0] sm:$0xf0]  ;;  %v1490_v26 = vld [vmem:[#allocation5 + $0xdc] sm:$0xf] }
  0x50   : > { %411 = vmatpush.bf16.msra.mxu0 %v1252_v46  ;;  %1519 = vmatpush.bf16.msra.mxu2 %v1252_v46  ;;  %v1423_v46 = vld [vmem:[#allocation5 + $0x140] sm:$0xf]  ;;  %v1368_v25 = vor.u32 %v1491_v22, %v1367_v21  ;;  %v1492_v32 = vld [vmem:[#allocation5 + $0xe8] sm:$0xf0]  ;;  %v1487_v41 = vld [vmem:[#allocation5 + $0xc4] sm:$0xf] }
  0x51   : > { %v1375_v31 = vld [vmem:[#allocation5 + $0xe0] sm:$0xf]  ;;  %v1357_v42 = vld [vmem:[#allocation5 + $0xcc] sm:$0xf0]  ;;  %v1489_v45 = vld [vmem:[#allocation5 + $0xd0] sm:$0xf0] }
  0x52   : > { %440 = vmatpush.bf16.msra.mxu1 %v1256_v59  ;;  %1527 = vmatpush.bf16.msra.mxu3 %v1256_v59  ;;  %v1501_v59 = vld [vmem:[#allocation5 + $0x130] sm:$0xf0]  ;;  %v1376_v35 = vor.u32 %v1492_v32, %v1375_v31  ;;  %v1355_v36 = vld [vmem:[#allocation5 + $0xc0] sm:$0xf] }
  0x53   : > { %412 = vmatmul.bf16.vlgmr.msra.gmra.mxu0 %v265_v56  ;;  %422 = vmatmul.bf16.vlgmr.msra.gmra.mxu2 %v267_v57 }
  0x54   : > { %462 = vmatpush.bf16.msrb.mxu2 %v1344_v50  ;;  %878 = vmatpush.bf16.msrb.mxu0 %v1444_v27  ;;  %v1424_v50 = vor.u32 %v1504_v47, %v1423_v46  ;;  %v1369_v27 = vld [vmem:[#allocation5 + $0xe4] sm:$0xf0] }
  0x55   : > { %441 = vmatmul.bf16.vlgmr.msra.gmra.mxu1 %v265_v56  ;;  %451 = vmatmul.bf16.vlgmr.msra.gmra.mxu3 %v267_v57  ;;  %v1372_v30 = vor.u32 %v1490_v26, %v1369_v27 }
  0x56   : > { %849 = vmatpush.bf16.msrb.mxu3 %v1440_v23  ;;  %907 = vmatpush.bf16.msrb.mxu1 %v1448_v28 }
  0x58   : > { %463 = vmatpush.bf16.msrb.mxu2 %v1332_v58  ;;  %879 = vmatpush.bf16.msrb.mxu0 %v1432_v38  ;;  %v1411_v58 = vld [vmem:[#allocation5 + $0x128] sm:$0xf]  ;;  %v1488_v38 = vld [vmem:[#allocation5 + $0xc8] sm:$0xf0] }
  0x59   : > { %v1412_v61 = vor.u32 %v1501_v59, %v1411_v58  ;;  %v1356_v40 = vor.u32 %v1488_v38, %v1355_v36 }
  0x5a   : > { %850 = vmatpush.bf16.msrb.mxu3 %v1428_v33  ;;  %908 = vmatpush.bf16.msrb.mxu1 %v1436_v39 }
  0x5c   : > { %464 = vmatpush.bf16.msrb.mxu2 %v1320_v62  ;;  %880 = vmatpush.bf16.msrb.mxu0 %v1420_v49  ;;  %v1391_v62 = vld [vmem:[#allocation5 + $0x108] sm:$0xf] }
  0x5d   : > { %v1392_v2 = vor.u32 %v1497_v63, %v1391_v62  ;;  %v2006_v63 = vperm.slane %v1975_v29, 1 }
  0x5e   : > { %851 = vmatpush.bf16.msrb.mxu3 %v1416_v44  ;;  %909 = vmatpush.bf16.msrb.mxu1 %v1424_v50  ;;  %v1363_v44 = vld [vmem:[#allocation5 + $0xc8] sm:$0xf] }
  0x5f   : > { %v1364_v47 = vor.u32 %v1489_v45, %v1363_v44 }
  0x60   : > { %465 = vmatpush.bf16.msrb.mxu2 %v1308_v1 }
  0x62   : > { %910 = vmatpush.bf16.msrb.mxu1 %v1412_v61 }
  0x63   : > { %417 = vmatmul.bf16.gmra.mxu0 %v266_v11  ;;  %427 = vmatmul.bf16.gmra.mxu2 %v268_v12 }
  0x64   : > { %466 = vmatpush.bf16.msrb.mxu2 %v1296_v8  ;;  %v1400_v8 = vor.u32 %v1498_v7, %v1399_v4  ;;  %v2012_v4 = vperm.slane %v1975_v29, 2 }
  0x65   : > { %446 = vmatmul.bf16.gmra.mxu1 %v266_v11  ;;  %456 = vmatmul.bf16.gmra.mxu3 %v268_v12 }
  0x66   : > { %911 = vmatpush.bf16.msrb.mxu1 %v1400_v8 }
  0x68   : > { %467 = vmatpush.bf16.msrb.mxu2 %v1284_v13  ;;  %v1493_v13 = vld [vmem:[#allocation5 + $0xf4] sm:$0xf] }
  0x6a   : > { %912 = vmatpush.bf16.msrb.mxu1 %v1388_v20 }
  0x6c   : > { %468 = vmatpush.bf16.msrb.mxu2 %v1272_v16  ;;  %v1384_v16 = vor.u32 %v1493_v13, %v1381_v14 }
  0x6e   : > { %913 = vmatpush.bf16.msrb.mxu1 %v1376_v35 }
  0x70   : > { %469 = vmatpush.bf16.msrb.mxu2 %v1260_v19 }
  0x72   : > { %914 = vmatpush.bf16.msrb.mxu1 %v1364_v47 }
  0x73   : > { %470 = vmatmul.bf16.vlgmr.msrb.gmra.mxu2 %v265_v56  ;;  %v1404_v56 = vor.u32 %v1500_v53, %v1403_v52 }
  0x75   : > { %852 = vmatpush.bf16.msrb.mxu3 %v1404_v56 }
  0x79   : > { %853 = vmatpush.bf16.msrb.mxu3 %v1392_v2 }
  0x83   : > { %475 = vmatmul.bf16.gmra.mxu2 %v266_v11  ;;  %v1494_v11 = vld [vmem:[#allocation5 + $0xf8] sm:$0xf0] }
  0x93   : > { %480 = vmatmul.bf16.gmra.mxu2 %v267_v57  ;;  %v1408_v57 = vor.u32 %v1499_v54, %v1405_v55 }
  0x95   : > { %881 = vmatpush.bf16.msrb.mxu0 %v1408_v57 }
  0x99   : > { %882 = vmatpush.bf16.msrb.mxu0 %v1396_v6 }
  0x9d   : > { %883 = vmatpush.bf16.msrb.mxu0 %v1384_v16 }
  0xa1   : > { %884 = vmatpush.bf16.msrb.mxu0 %v1372_v30 }
  0xa3   : > { %485 = vmatmul.bf16.gmra.mxu2 %v268_v12  ;;  %v1380_v12 = vor.u32 %v1494_v11, %v1379_v10 }
  0xa5   : > { %854 = vmatpush.bf16.msrb.mxu3 %v1380_v12 }
  0xa9   : > { %855 = vmatpush.bf16.msrb.mxu3 %v1368_v25 }
  0xad   : > { %856 = vmatpush.bf16.msrb.mxu3 %v1356_v40 }
  0xd0   : > { %v413_v43 = vpop.f32.mrf.mxu0 }
  0xd1   : > { %v414_v48 = vadd.f32 %v413_v43, %v1978_v37  ;;  %v1360_v43 = vor.u32 %v1487_v41, %v1357_v42 }
  0xd3   : > { %v1345_v51 = vmul.f32 -1.442695, %v414_v48  ;;  %885 = vmatpush.bf16.msrb.mxu0 %v1360_v43 }
  0xd5   : > { %1601 = vpow2.f32 %v1345_v51  ;;  %v442_v51 = vpop.f32.mrf.mxu1 }
  0xd6   : > { %v1981_v60 = vpop.f32.mrf.mxu2  ;;  %v443_v6 = vadd.f32 %v442_v51, %v2006_v63 }
  0xd7   : > { %v424_v56 = vadd.f32 %v1981_v60, %v1978_v37 }
  0xd8   : > { %v415_v1 = vpop.f32.mrf.mxu0  ;;  %v643_v11 = vmax.f32 %v443_v6, 0.0  ;;  %v452_v6 = vpop.f32.mrf.mxu3 }
  0xd9   : > { %v416_v5 = vadd.f32 %v415_v1, %v1978_v37  ;;  %v1349_v61 = vmul.f32 -1.442695, %v424_v56 }
  0xdb   : > { %v1346_v9 = vmul.f32 -1.442695, %v416_v5  ;;  %v1602_v15 = vpop.eup %1601 }
  0xdc   : > { %v1984_v23 = vadd.f32 1.0, %v1602_v15 }
  0xdd   : > { %1603 = vpow2.f32 %v1346_v9  ;;  %v444_v60 = vpop.f32.mrf.mxu1 }
  0xde   : > { %v425_v19 = vpop.f32.mrf.mxu2  ;;  %1605 = vrcp.f32 %v1984_v23  ;;  %vm528_vm0 = vweird.f32 %v1984_v23  ;;  %v532_v9 = vand.u32 2147483647, %v1984_v23  ;;  %v534_v29 = vand.u32 2147483648, %v1984_v23 }
  0xdf   : > { %v426_v62 = vadd.f32 %v425_v19, %v1978_v37  ;;  %v445_v15 = vadd.f32 %v444_v60, %v2006_v63 }
  0xe0   : > { %v418_v24 = vpop.f32.mrf.mxu0  ;;  %vm2031_vm3 = vcmp.eq.f32.partialorder %v532_v9, 8.507059e+37  ;;  %v535_v22 = vor.u32 1.1754944e-38, %v534_v29 }
  0xe1   : > { %v419_v28 = vadd.f32 %v418_v24, %v1978_v37  ;;  %v1350_v5 = vmul.f32 -1.442695, %v426_v62 }
  0xe3   : > { %v1604_v33 = vpop.eup %1603  ;;  %v1347_v34 = vmul.f32 -1.442695, %v419_v28  ;;  %v644_v28 = vmax.f32 %v445_v15, 0.0 }
  0xe4   : > { %v1988_v39 = vadd.f32 1.0, %v1604_v33  ;;  %v1992_v50 = vpop.eup %1605 }
  0xe5   : > { %v524_v55 = vmul.f32 %v1992_v50, %v1984_v23  ;;  %vm529_vm1 = vweird.f32 %v1992_v50  ;;  %v447_v30 = vpop.f32.mrf.mxu1 }
  0xe6   : > { %1607 = vrcp.f32 %v1988_v39  ;;  %v428_v46 = vpop.f32.mrf.mxu2  ;;  %vm2027_vm2 = vmor %vm528_vm0, %vm529_vm1  ;;  %v547_v23 = vand.u32 2147483647, %v1988_v39  ;;  %v549_v24 = vand.u32 2147483648, %v1988_v39  ;;  %vm543_vm5 = vweird.f32 %v1988_v39 }
  0xe7   : > { %1609 = vpow2.f32 %v1347_v34  ;;  %v525_v0 = vsub.f32 1.0, %v524_v55  ;;  %v429_v21 = vadd.f32 %v428_v46, %v1978_v37 }
  0xe8   : > { %v420_v48 = vpop.f32.mrf.mxu0  ;;  %vm548_vm7 = vcmp.eq.f32.partialorder %v547_v23, 8.507059e+37  ;;  %v550_v41 = vor.u32 1.1754944e-38, %v549_v24 }
  0xe9   : > { %v421_v49 = vadd.f32 %v420_v48, %v1978_v37  ;;  %v526_v7 = vmul.f32 %v1992_v50, %v525_v0 }
  0xeb   : > { %v1348_v52 = vmul.f32 -1.442695, %v421_v49  ;;  %v527_v13 = vadd.f32 %v1992_v50, %v526_v7 }
  0xec   : > { %v1994_v53 = vpop.eup %1607 }
  0xed   : > { %v1610_v54 = vpop.eup %1609  ;;  %1611 = vpow2.f32 %v1348_v52  ;;  %v539_v58 = vmul.f32 %v1994_v53, %v1988_v39  ;;  %vm544_vm4 = vweird.f32 %v1994_v53  ;;  %v531_v26 = vsel %vm2027_vm2, %v1992_v50, %v527_v13 }
  0xee   : > { %v430_v57 = vpop.f32.mrf.mxu2  ;;  %v2002_v59 = vadd.f32 1.0, %v1610_v54  ;;  %vm2048_vm6 = vmor %vm543_vm5, %vm544_vm4  ;;  %v1351_v39 = vmul.f32 -1.442695, %v429_v21  ;;  %v536_v40 = vsel %vm2031_vm3, %v535_v22, %v531_v26  ;;  %v448_v50 = vadd.f32 %v447_v30, %v2006_v63 }
  0xef   : > { %v540_v2 = vsub.f32 1.0, %v539_v58  ;;  %v431_v42 = vadd.f32 %v430_v57, %v1978_v37  ;;  %v449_v57 = vpop.f32.mrf.mxu1 }
  0xf0   : > { %1613 = vrcp.f32 %v2002_v59  ;;  %vm558_vm8 = vweird.f32 %v2002_v59  ;;  %v562_v58 = vand.u32 2147483647, %v2002_v59  ;;  %v645_v0 = vmax.f32 %v448_v50, 0.0 }
  0xf1   : > { %1615 = vpow2.f32 %v1349_v61  ;;  %v541_v10 = vmul.f32 %v1994_v53, %v540_v2  ;;  %v1352_v51 = vmul.f32 -1.442695, %v431_v42  ;;  %v564_v61 = vand.u32 2147483648, %v2002_v59 }
  0xf2   : > { %v450_v7 = vadd.f32 %v449_v57, %v2006_v63  ;;  %vm563_vm12 = vcmp.eq.f32.partialorder %v562_v58, 8.507059e+37 }
  0xf3   : > { %v1612_v1 = vpop.eup %1611  ;;  %v542_v19 = vadd.f32 %v1994_v53, %v541_v10  ;;  %v565_v29 = vor.u32 1.1754944e-38, %v564_v61 }
  0xf4   : > { %v2009_v3 = vadd.f32 1.0, %v1612_v1  ;;  %v646_v18 = vmax.f32 %v450_v7, 0.0 }
  0xf5   : > { %v546_v38 = vsel %vm2048_vm6, %v1994_v53, %v542_v19 }
  0xf6   : > { %1617 = vrcp.f32 %v2009_v3  ;;  %v471_v8 = vpop.f32.mrf.mxu2  ;;  %v2024_v14 = vpop.eup %1613  ;;  %v551_v47 = vsel %vm548_vm7, %v550_v41, %v546_v38  ;;  %vm573_vm13 = vweird.f32 %v2009_v3  ;;  %v577_v13 = vand.u32 2147483647, %v2009_v3 }
  0xf7   : > { %1619 = vpow2.f32 %v1350_v5  ;;  %v472_v12 = vadd.f32 %v471_v8, %v2012_v4  ;;  %v1616_v17 = vpop.eup %1615  ;;  %v554_v25 = vmul.f32 %v2024_v14, %v2002_v59  ;;  %vm559_vm9 = vweird.f32 %v2024_v14 }
  0xf8   : > { %v2052_v34 = vadd.f32 1.0, %v1616_v17  ;;  %vm2080_vm10 = vmor %vm558_vm8, %vm559_vm9  ;;  %v579_v59 = vand.u32 2147483648, %v2009_v3  ;;  %vm578_vm15 = vcmp.eq.f32.partialorder %v577_v13, 8.507059e+37 }
  0xf9   : > { %v651_v27 = vsub.f32 %v643_v11, %v472_v12  ;;  %v555_v45 = vsub.f32 1.0, %v554_v25 }
  0xfa   : > { %1621 = vrcp.f32 %v2052_v34  ;;  %vm588_vm1 = vweird.f32 %v2052_v34 }
  0xfb   : > { %v659_v43 = vmul.f32 %v651_v27, %v536_v40  ;;  %1623 = vpow2.f32 %v1351_v39  ;;  %v556_v54 = vmul.f32 %v2024_v14, %v555_v45  ;;  %v594_v45 = vand.u32 2147483648, %v2052_v34 }
  0xfc   : > { %v2037_v20 = vpop.eup %1617 }
  0xfd   : > { %v1620_v33 = vpop.eup %1619  ;;  %v569_v35 = vmul.f32 %v2037_v20, %v2009_v3  ;;  %v667_v52 = vadd.f32 %v659_v43, %v472_v12  ;;  %v557_v2 = vadd.f32 %v2024_v14, %v556_v54  ;;  %vm574_vm11 = vweird.f32 %v2037_v20 }
  0xfe   : > { %v473_v31 = vpop.f32.mrf.mxu2  ;;  %v2063_v46 = vadd.f32 1.0, %v1620_v33  ;;  %vm575_vm14 = vmor %vm573_vm13, %vm574_vm11  ;;  %v453_v33 = vadd.f32 %v452_v6, %v2006_v63 }
  0xff   : > { %v474_v36 = vadd.f32 %v473_v31, %v2012_v4  ;;  %v570_v49 = vsub.f32 1.0, %v569_v35  ;;  %v561_v11 = vsel %vm2080_vm10, %v2024_v14, %v557_v2  ;;  %v580_v14 = vor.u32 1.1754944e-38, %v579_v59  ;;  %v454_v31 = vpop.f32.mrf.mxu3 }
 0x100   : > { %1625 = vrcp.f32 %v2063_v46  ;;  %v2074_v62 = vpop.eup %1621  ;;  %v566_v23 = vsel %vm563_vm12, %v565_v29, %v561_v11  ;;  %v647_v40 = vmax.f32 %v453_v33, 0.0  ;;  %vm603_vm4 = vweird.f32 %v2063_v46 }
 0x101   : > { %v652_v44 = vsub.f32 %v644_v28, %v474_v36  ;;  %v571_v56 = vmul.f32 %v2037_v20, %v570_v49  ;;  %1627 = vpow2.f32 %v1352_v51  ;;  %v1624_v60 = vpop.eup %1623  ;;  %v584_v10 = vmul.f32 %v2074_v62, %v2052_v34 }
 0x102   : > { %v2101_v22 = vadd.f32 1.0, %v1624_v60  ;;  %vm589_vm0 = vweird.f32 %v2074_v62  ;;  %v609_v51 = vand.u32 2147483648, %v2063_v46  ;;  %v607_v54 = vand.u32 2147483647, %v2063_v46 }
 0x103   : > { %v660_v48 = vmul.f32 %v652_v44, %v551_v47  ;;  %v572_v8 = vadd.f32 %v2037_v20, %v571_v56  ;;  %v585_v26 = vsub.f32 1.0, %v584_v10  ;;  %v592_v44 = vand.u32 2147483647, %v2052_v34  ;;  %vm2123_vm3 = vmor %vm588_vm1, %vm589_vm0 }
 0x104   : > { %1629 = vrcp.f32 %v2101_v22  ;;  %v455_v47 = vadd.f32 %v454_v31, %v2006_v63  ;;  %v610_v2 = vor.u32 1.1754944e-38, %v609_v51  ;;  %vm608_vm7 = vcmp.eq.f32.partialorder %v607_v54, 8.507059e+37 }
 0x105   : > { %v668_v53 = vadd.f32 %v660_v48, %v474_v36  ;;  %v576_v21 = vsel %vm575_vm14, %v2037_v20, %v572_v8  ;;  %v586_v35 = vmul.f32 %v2074_v62, %v585_v26  ;;  %vm593_vm5 = vcmp.eq.f32.partialorder %v592_v44, 8.507059e+37 }
 0x106   : > { %v476_v37 = vpop.f32.mrf.mxu2  ;;  %v2087_v9 = vpop.eup %1625  ;;  %v581_v27 = vsel %vm578_vm15, %v580_v14, %v576_v21  ;;  %v648_v58 = vmax.f32 %v455_v47, 0.0  ;;  %vm618_vm9 = vweird.f32 %v2101_v22  ;;  %v622_v21 = vand.u32 2147483647, %v2101_v22 }
 0x107   : > { %v710_v55 = vpack.c.bf16 %v668_v53, %v667_v52  ;;  %v477_v1 = vadd.f32 %v476_v37, %v2012_v4  ;;  %v1628_v16 = vpop.eup %1627  ;;  %v599_v17 = vmul.f32 %v2087_v9, %v2063_v46  ;;  %v587_v42 = vadd.f32 %v2074_v62, %v586_v35 }
 0x108   : > { %v2103_v3 = vadd.f32 1.0, %v1628_v16  ;;  %vm604_vm2 = vweird.f32 %v2087_v9  ;;  %v595_v37 = vor.u32 1.1754944e-38, %v594_v45  ;;  %vm623_vm14 = vcmp.eq.f32.partialorder %v622_v21, 8.507059e+37 }
 0x109   : > { %857 = vmatmul.bf16.vlgmr.msrb.gmra.mxu3 %v710_v55  ;;  %886 = vmatmul.bf16.vlgmr.msrb.gmra.mxu0 %v710_v55  ;;  %v653_v12 = vsub.f32 %v645_v0, %v477_v1  ;;  %v600_v30 = vsub.f32 1.0, %v599_v17  ;;  %v591_v34 = vsel %vm2123_vm3, %v2074_v62, %v587_v42  ;;  %vm605_vm6 = vmor %vm603_vm4, %vm604_vm2 }
 0x10a   : > { %915 = vmatmul.bf16.vlgmr.msrb.gmra.mxu1 %v710_v55  ;;  %1631 = vrcp.f32 %v2103_v3  ;;  %v2113_v43 = vpop.eup %1629  ;;  %v457_v55 = vpop.f32.mrf.mxu3  ;;  %v639_v14 = vand.u32 2147483648, %v2103_v3  ;;  %vm633_vm12 = vweird.f32 %v2103_v3  ;;  %v637_v26 = vand.u32 2147483647, %v2103_v3 }
 0x10b   : > { %v661_v24 = vmul.f32 %v653_v12, %v566_v23  ;;  %v601_v39 = vmul.f32 %v2087_v9, %v600_v30  ;;  %v614_v52 = vmul.f32 %v2113_v43, %v2101_v22  ;;  %v458_v10 = vadd.f32 %v457_v55, %v2006_v63 }
 0x10c   : > { %vm619_vm8 = vweird.f32 %v2113_v43  ;;  %vm638_vm15 = vcmp.eq.f32.partialorder %v637_v26, 8.507059e+37 }
 0x10d   : > { %v669_v32 = vadd.f32 %v661_v24, %v477_v1  ;;  %v602_v48 = vadd.f32 %v2087_v9, %v601_v39  ;;  %v596_v1 = vsel %vm593_vm5, %v595_v37, %v591_v34  ;;  %v615_v5 = vsub.f32 1.0, %v614_v52  ;;  %vm620_vm11 = vmor %vm618_vm9, %vm619_vm8 }
 0x10e   : > { %v478_v15 = vpop.f32.mrf.mxu2 }
 0x10f   : > { %v479_v19 = vadd.f32 %v478_v15, %v2012_v4  ;;  %v606_v0 = vsel %vm605_vm6, %v2087_v9, %v602_v48  ;;  %v616_v59 = vmul.f32 %v2113_v43, %v615_v5  ;;  %v649_v15 = vmax.f32 %v458_v10, 0.0 }
 0x110   : > { %v2121_v49 = vpop.eup %1631  ;;  %v611_v46 = vsel %vm608_vm7, %v610_v2, %v606_v0 }
 0x111   : > { %v654_v25 = vsub.f32 %v646_v18, %v479_v19  ;;  %v629_v57 = vmul.f32 %v2121_v49, %v2103_v3  ;;  %v617_v17 = vadd.f32 %v2113_v43, %v616_v59  ;;  %v624_v18 = vand.u32 2147483648, %v2101_v22  ;;  %v709_v3 = vld [vmem:[#allocation7 + $0x1] ss:$2 sm:$0x7] }
 0x112   : > { %v459_v9 = vpop.f32.mrf.mxu3  ;;  %vm634_vm10 = vweird.f32 %v2121_v49  ;;  %v2161_v34 = vperm.slane %v709_v3, 1 }
 0x113   : > { %v662_v28 = vmul.f32 %v654_v25, %v581_v27  ;;  %v630_v7 = vsub.f32 1.0, %v629_v57  ;;  %v621_v24 = vsel %vm620_vm11, %v2113_v43, %v617_v17  ;;  %v625_v27 = vor.u32 1.1754944e-38, %v624_v18  ;;  %vm635_vm13 = vmor %vm633_vm12, %vm634_vm10 }
 0x115   : > { %v670_v20 = vadd.f32 %v662_v28, %v479_v19  ;;  %v631_v13 = vmul.f32 %v2121_v49, %v630_v7  ;;  %v460_v19 = vadd.f32 %v459_v9, %v2006_v63  ;;  %v626_v31 = vsel %vm623_vm14, %v625_v27, %v621_v24 }
 0x116   : > { %v481_v36 = vpop.f32.mrf.mxu2 }
 0x117   : > { %v711_v38 = vpack.c.bf16 %v670_v20, %v669_v32  ;;  %v482_v41 = vadd.f32 %v481_v36, %v2012_v4  ;;  %v632_v23 = vadd.f32 %v2121_v49, %v631_v13  ;;  %v650_v63 = vmax.f32 %v460_v19, 0.0 }
 0x118   : > { %v640_v32 = vor.u32 1.1754944e-38, %v639_v14 }
 0x119   : > { %862 = vmatmul.bf16.gmra.mxu3 %v711_v38  ;;  %891 = vmatmul.bf16.gmra.mxu0 %v711_v38  ;;  %v655_v53 = vsub.f32 %v647_v40, %v482_v41  ;;  %v636_v30 = vsel %vm635_vm13, %v2121_v49, %v632_v23 }
 0x11a   : > { %920 = vmatmul.bf16.gmra.mxu1 %v711_v38  ;;  %v641_v35 = vsel %vm638_vm15, %v640_v32, %v636_v30 }
 0x11b   : > { %v663_v60 = vmul.f32 %v655_v53, %v596_v1  ;;  %v2165_v1 = vperm.slane %v709_v3, 2 }
 0x11d   : > { %v671_v8 = vadd.f32 %v663_v60, %v482_v41  ;;  %v2157_v41 = vperm.slane %v709_v3, 0 }
 0x11e   : > { %v483_v56 = vpop.f32.mrf.mxu2 }
 0x11f   : > { %v484_v61 = vadd.f32 %v483_v56, %v2012_v4 }
 0x121   : > { %v656_v62 = vsub.f32 %v648_v58, %v484_v61 }
 0x123   : > { %v664_v6 = vmul.f32 %v656_v62, %v611_v46 }
 0x125   : > { %v672_v29 = vadd.f32 %v664_v6, %v484_v61 }
 0x126   : > { %v486_v11 = vpop.f32.mrf.mxu2 }
 0x127   : > { %v712_v12 = vpack.c.bf16 %v672_v29, %v671_v8  ;;  %v487_v16 = vadd.f32 %v486_v11, %v2012_v4 }
 0x129   : > { %867 = vmatmul.bf16.gmra.mxu3 %v712_v12  ;;  %896 = vmatmul.bf16.gmra.mxu0 %v712_v12  ;;  %v657_v25 = vsub.f32 %v649_v15, %v487_v16 }
 0x12a   : > { %925 = vmatmul.bf16.gmra.mxu1 %v712_v12 }
 0x12b   : > { %v665_v33 = vmul.f32 %v657_v25, %v626_v31 }
 0x12d   : > { %v673_v38 = vadd.f32 %v665_v33, %v487_v16 }
 0x12e   : > { %v488_v28 = vpop.f32.mrf.mxu2 }
 0x12f   : > { %v489_v22 = vadd.f32 %v488_v28, %v2012_v4 }
 0x131   : > { %v658_v20 = vsub.f32 %v650_v63, %v489_v22 }
 0x133   : > { %v666_v36 = vmul.f32 %v658_v20, %v641_v35 }
 0x135   : > { %v674_v39 = vadd.f32 %v666_v36, %v489_v22 }
 0x137   : > { %v713_v40 = vpack.c.bf16 %v674_v39, %v673_v38 }
 0x139   : > { %872 = vmatmul.bf16.gmra.mxu3 %v713_v40  ;;  %901 = vmatmul.bf16.gmra.mxu0 %v713_v40 }
 0x13a   : > { %930 = vmatmul.bf16.gmra.mxu1 %v713_v40 }
 0x186   : > { %v887_v43 = vpop.f32.mrf.mxu0 }
 0x187   : > { %v916_v48 = vpop.f32.mrf.mxu1  ;;  %v888_v57 = vadd.f32 %v887_v43, %v2161_v34 }
 0x188   : > { %v917_v10 = vadd.f32 %v916_v48, %v2165_v1 }
 0x189   : > { %v1088_v62 = vmax.f32 %v888_v57, 0.0 }
 0x18b   : > { %v1096_v13 = vsub.f32 %v1088_v62, %v917_v10 }
 0x18c   : > { %v858_v42 = vpop.f32.mrf.mxu3 }
 0x18d   : > { %v859_v4 = vadd.f32 %v858_v42, %v2157_v41 }
 0x18e   : > { %v889_v52 = vpop.f32.mrf.mxu0 }
 0x18f   : > { %v1449_v44 = vmul.f32 -1.442695, %v859_v4  ;;  %v918_v58 = vpop.f32.mrf.mxu1  ;;  %v890_v15 = vadd.f32 %v889_v52, %v2161_v34 }
 0x190   : > { %v919_v32 = vadd.f32 %v918_v58, %v2165_v1 }
 0x191   : > { %1633 = vpow2.f32 %v1449_v44  ;;  %v1089_v24 = vmax.f32 %v890_v15, 0.0 }
 0x193   : > { %v1097_v40 = vsub.f32 %v1089_v24, %v919_v32 }
 0x194   : > { %v860_v45 = vpop.f32.mrf.mxu3 }
 0x195   : > { %v861_v47 = vadd.f32 %v860_v45, %v2157_v41 }
 0x196   : > { %v892_v60 = vpop.f32.mrf.mxu0 }
 0x197   : > { %v1634_v49 = vpop.eup %1633  ;;  %v1450_v50 = vmul.f32 -1.442695, %v861_v47  ;;  %v921_v21 = vpop.f32.mrf.mxu1  ;;  %v893_v36 = vadd.f32 %v892_v60, %v2161_v34 }
 0x198   : > { %v960_v51 = vadd.f32 1.0, %v1634_v49 }
 0x199   : > { %1635 = vpow2.f32 %v1450_v50  ;;  %v1090_v45 = vmax.f32 %v893_v36, 0.0 }
 0x19a   : > { %1637 = vrcp.f32 %v960_v51  ;;  %v979_v5 = vand.u32 2147483648, %v960_v51  ;;  %v977_v7 = vand.u32 2147483647, %v960_v51  ;;  %vm973_vm1 = vweird.f32 %v960_v51 }
 0x19c   : > { %v863_v53 = vpop.f32.mrf.mxu3  ;;  %v980_v9 = vor.u32 1.1754944e-38, %v979_v5  ;;  %vm978_vm3 = vcmp.eq.f32.partialorder %v977_v7, 8.507059e+37 }
 0x19d   : > { %v864_v54 = vadd.f32 %v863_v53, %v2157_v41 }
 0x19e   : > { %v894_v22 = vpop.f32.mrf.mxu0 }
 0x19f   : > { %v1636_v37 = vpop.eup %1635  ;;  %v1451_v55 = vmul.f32 -1.442695, %v864_v54  ;;  %v923_v49 = vpop.f32.mrf.mxu1  ;;  %v922_v54 = vadd.f32 %v921_v21, %v2165_v1 }
 0x1a0   : > { %v1638_v56 = vpop.eup %1637  ;;  %v961_v61 = vadd.f32 1.0, %v1636_v37 }
 0x1a1   : > { %v969_v0 = vmul.f32 %v1638_v56, %v960_v51  ;;  %1639 = vpow2.f32 %v1451_v55  ;;  %vm974_vm0 = vweird.f32 %v1638_v56  ;;  %v1098_v58 = vsub.f32 %v1090_v45, %v922_v54 }
 0x1a2   : > { %1641 = vrcp.f32 %v961_v61  ;;  %vm975_vm2 = vmor %vm973_vm1, %vm974_vm0  ;;  %v994_v25 = vand.u32 2147483648, %v961_v61  ;;  %v992_v63 = vand.u32 2147483647, %v961_v61  ;;  %vm988_vm5 = vweird.f32 %v961_v61 }
 0x1a3   : > { %v970_v2 = vsub.f32 1.0, %v969_v0  ;;  %v895_v0 = vadd.f32 %v894_v22, %v2161_v34 }
 0x1a4   : > { %v865_v46 = vpop.f32.mrf.mxu3  ;;  %v995_v35 = vor.u32 1.1754944e-38, %v994_v25  ;;  %vm993_vm7 = vcmp.eq.f32.partialorder %v992_v63, 8.507059e+37 }
 0x1a5   : > { %v971_v6 = vmul.f32 %v1638_v56, %v970_v2  ;;  %v866_v8 = vadd.f32 %v865_v46, %v2157_v41 }
 0x1a6   : > { %v897_v55 = vpop.f32.mrf.mxu0 }
 0x1a7   : > { %v1640_v29 = vpop.eup %1639  ;;  %v972_v59 = vadd.f32 %v1638_v56, %v971_v6  ;;  %v1452_v11 = vmul.f32 -1.442695, %v866_v8  ;;  %v1091_v8 = vmax.f32 %v895_v0, 0.0 }
 0x1a8   : > { %v1642_v12 = vpop.eup %1641  ;;  %v2170_v16 = vadd.f32 1.0, %v1640_v29 }
 0x1a9   : > { %v976_v17 = vsel %vm975_vm2, %v1638_v56, %v972_v59  ;;  %v984_v18 = vmul.f32 %v1642_v12, %v961_v61  ;;  %1643 = vpow2.f32 %v1452_v11  ;;  %vm989_vm4 = vweird.f32 %v1642_v12 }
 0x1aa   : > { %v981_v19 = vsel %vm978_vm3, %v980_v9, %v976_v17  ;;  %1645 = vrcp.f32 %v2170_v16  ;;  %vm990_vm6 = vmor %vm988_vm5, %vm989_vm4  ;;  %v1007_v47 = vand.u32 2147483647, %v2170_v16  ;;  %v1009_v48 = vand.u32 2147483648, %v2170_v16  ;;  %v926_v9 = vpop.f32.mrf.mxu1 }
 0x1ab   : > { %v1104_v23 = vmul.f32 %v1096_v13, %v981_v19  ;;  %v985_v14 = vsub.f32 1.0, %v984_v18  ;;  %vm1003_vm9 = vweird.f32 %v2170_v16 }
 0x1ac   : > { %v868_v26 = vpop.f32.mrf.mxu3  ;;  %v1010_v61 = vor.u32 1.1754944e-38, %v1009_v48  ;;  %vm1008_vm11 = vcmp.eq.f32.partialorder %v1007_v47, 8.507059e+37 }
 0x1ad   : > { %v1112_v27 = vadd.f32 %v1104_v23, %v917_v10  ;;  %v986_v28 = vmul.f32 %v1642_v12, %v985_v14  ;;  %v869_v30 = vadd.f32 %v868_v26, %v2157_v41 }
 0x1ae   : > { %v899_v24 = vpop.f32.mrf.mxu0 }
 0x1af   : > { %v1644_v31 = vpop.eup %1643  ;;  %1120 = vst [vmem:[%s2176_s18] sm:$0xff] %v1112_v27  ;;  %v987_v33 = vadd.f32 %v1642_v12, %v986_v28  ;;  %v1453_v39 = vmul.f32 -1.442695, %v869_v30  ;;  %v898_v27 = vadd.f32 %v897_v55, %v2161_v34 }
 0x1b0   : > { %v1646_v20 = vpop.eup %1645  ;;  %v963_v38 = vadd.f32 1.0, %v1644_v31 }
 0x1b1   : > { %v991_v3 = vsel %vm990_vm6, %v1642_v12, %v987_v33  ;;  %v999_v42 = vmul.f32 %v1646_v20, %v2170_v16  ;;  %vm1004_vm8 = vweird.f32 %v1646_v20  ;;  %v924_v16 = vadd.f32 %v923_v49, %v2165_v1 }
 0x1b2   : > { %v996_v4 = vsel %vm993_vm7, %v995_v35, %v991_v3  ;;  %1647 = vrcp.f32 %v963_v38  ;;  %vm1005_vm10 = vmor %vm1003_vm9, %vm1004_vm8  ;;  %v1022_v10 = vand.u32 2147483647, %v963_v38  ;;  %v1024_v29 = vand.u32 2147483648, %v963_v38 }
 0x1b3   : > { %v1105_v43 = vmul.f32 %v1097_v40, %v996_v4  ;;  %v1000_v44 = vsub.f32 1.0, %v999_v42  ;;  %1649 = vpow2.f32 %v1453_v39  ;;  %vm1018_vm13 = vweird.f32 %v963_v38  ;;  %v928_v4 = vpop.f32.mrf.mxu1 }
 0x1b4   : > { %v870_v50 = vpop.f32.mrf.mxu3  ;;  %v1025_v19 = vor.u32 1.1754944e-38, %v1024_v29  ;;  %v1099_v23 = vsub.f32 %v1091_v8, %v924_v16  ;;  %vm1023_vm15 = vcmp.eq.f32.partialorder %v1022_v10, 8.507059e+37  ;;  %v1092_v33 = vmax.f32 %v898_v27, 0.0 }
 0x1b5   : > { %v1113_v51 = vadd.f32 %v1105_v43, %v919_v32  ;;  %v1001_v52 = vmul.f32 %v1646_v20, %v1000_v44  ;;  %v871_v53 = vadd.f32 %v870_v50, %v2157_v41  ;;  %v927_v3 = vadd.f32 %v926_v9, %v2165_v1 }
 0x1b6   : > { %v900_v42 = vadd.f32 %v899_v24, %v2161_v34  ;;  %v902_v50 = vpop.f32.mrf.mxu0 }
 0x1b7   : > { %1121 = vst [vmem:[%s2176_s18 + $0x8] sm:$0xff] %v1113_v51  ;;  %v1002_v37 = vadd.f32 %v1646_v20, %v1001_v52  ;;  %v1454_v56 = vmul.f32 -1.442695, %v871_v53  ;;  %v1100_v47 = vsub.f32 %v1092_v33, %v927_v3 }
 0x1b8   : > { %v1648_v57 = vpop.eup %1647  ;;  %v1093_v52 = vmax.f32 %v900_v42, 0.0 }
 0x1b9   : > { %v1650_v2 = vpop.eup %1649  ;;  %v1006_v60 = vsel %vm1005_vm10, %v1646_v20, %v1002_v37  ;;  %v1014_v62 = vmul.f32 %v1648_v57, %v963_v38  ;;  %1651 = vpow2.f32 %v1454_v56  ;;  %vm1019_vm12 = vweird.f32 %v1648_v57 }
 0x1ba   : > { %v1011_v5 = vsel %vm1008_vm11, %v1010_v61, %v1006_v60  ;;  %v964_v46 = vadd.f32 1.0, %v1650_v2  ;;  %vm1020_vm14 = vmor %vm1018_vm13, %vm1019_vm12  ;;  %v903_v60 = vadd.f32 %v902_v50, %v2161_v34 }
 0x1bb   : > { %v1106_v6 = vmul.f32 %v1098_v58, %v1011_v5  ;;  %v1015_v7 = vsub.f32 1.0, %v1014_v62  ;;  %v929_v58 = vadd.f32 %v928_v4, %v2165_v1  ;;  %v931_v8 = vpop.f32.mrf.mxu1 }
 0x1bc   : > { %1653 = vrcp.f32 %v964_v46  ;;  %v873_v59 = vpop.f32.mrf.mxu3  ;;  %v1039_v20 = vand.u32 2147483648, %v964_v46  ;;  %v1037_v38 = vand.u32 2147483647, %v964_v46  ;;  %vm1033_vm1 = vweird.f32 %v964_v46 }
 0x1bd   : > { %v1114_v11 = vadd.f32 %v1106_v6, %v922_v54  ;;  %v1016_v12 = vmul.f32 %v1648_v57, %v1015_v7  ;;  %v874_v13 = vadd.f32 %v873_v59, %v2157_v41  ;;  %v1101_v5 = vsub.f32 %v1093_v52, %v929_v58 }
 0x1be   : > { %vm1038_vm3 = vcmp.eq.f32.partialorder %v1037_v38, 8.507059e+37  ;;  %v1094_v59 = vmax.f32 %v903_v60, 0.0 }
 0x1bf   : > { %v1652_v15 = vpop.eup %1651  ;;  %1122 = vst [vmem:[%s2176_s18 + $0x10] sm:$0xff] %v1114_v11  ;;  %v1017_v17 = vadd.f32 %v1648_v57, %v1016_v12  ;;  %v1455_v18 = vmul.f32 -1.442695, %v874_v13 }
 0x1c0   : > { %v965_v21 = vadd.f32 1.0, %v1652_v15  ;;  %v904_v15 = vpop.f32.mrf.mxu0 }
 0x1c1   : > { %v1021_v14 = vsel %vm1020_vm14, %v1648_v57, %v1017_v17  ;;  %1655 = vpow2.f32 %v1455_v18 }
 0x1c2   : > { %v1654_v25 = vpop.eup %1653  ;;  %v1026_v26 = vsel %vm1023_vm15, %v1025_v19, %v1021_v14  ;;  %1657 = vrcp.f32 %v965_v21  ;;  %v1054_v53 = vand.u32 2147483648, %v965_v21  ;;  %v1052_v55 = vand.u32 2147483647, %v965_v21 }
 0x1c3   : > { %v1107_v28 = vmul.f32 %v1099_v23, %v1026_v26  ;;  %v1029_v63 = vmul.f32 %v1654_v25, %v964_v46  ;;  %vm1034_vm0 = vweird.f32 %v1654_v25  ;;  %vm1048_vm5 = vweird.f32 %v965_v21 }
 0x1c4   : > { %v875_v22 = vpop.f32.mrf.mxu3  ;;  %vm1035_vm2 = vmor %vm1033_vm1, %vm1034_vm0  ;;  %v1055_v2 = vor.u32 1.1754944e-38, %v1054_v53  ;;  %vm1053_vm7 = vcmp.eq.f32.partialorder %v1052_v55, 8.507059e+37 }
 0x1c5   : > { %v1115_v30 = vadd.f32 %v1107_v28, %v924_v16  ;;  %v1030_v31 = vsub.f32 1.0, %v1029_v63  ;;  %v876_v32 = vadd.f32 %v875_v22, %v2157_v41  ;;  %v1040_v41 = vor.u32 1.1754944e-38, %v1039_v20  ;;  %v933_v63 = vpop.f32.mrf.mxu1 }
 0x1c6   : > { %v932_v16 = vadd.f32 %v931_v8, %v2165_v1 }
 0x1c7   : > { %v1656_v35 = vpop.eup %1655  ;;  %1123 = vst [vmem:[%s2176_s18 + $0x18] sm:$0xff] %v1115_v30  ;;  %v1031_v36 = vmul.f32 %v1654_v25, %v1030_v31  ;;  %v1456_v39 = vmul.f32 -1.442695, %v876_v32 }
 0x1c8   : > { %v1658_v40 = vpop.eup %1657  ;;  %v966_v43 = vadd.f32 1.0, %v1656_v35  ;;  %v1102_v23 = vsub.f32 %v1094_v59, %v932_v16 }
 0x1c9   : > { %v1032_v44 = vadd.f32 %v1654_v25, %v1031_v36  ;;  %v1044_v45 = vmul.f32 %v1658_v40, %v965_v21  ;;  %1659 = vpow2.f32 %v1456_v39  ;;  %vm1049_vm4 = vweird.f32 %v1658_v40 }
 0x1ca   : > { %1661 = vrcp.f32 %v966_v43  ;;  %vm1050_vm6 = vmor %vm1048_vm5, %vm1049_vm4  ;;  %v1069_v11 = vand.u32 2147483648, %v966_v43  ;;  %v1067_v9 = vand.u32 2147483647, %v966_v43  ;;  %vm1063_vm9 = vweird.f32 %v966_v43 }
 0x1cb   : > { %v1036_v48 = vsel %vm1035_vm2, %v1654_v25, %v1032_v44  ;;  %v1045_v49 = vsub.f32 1.0, %v1044_v45  ;;  %v905_v21 = vadd.f32 %v904_v15, %v2161_v34  ;;  %v934_v34 = vadd.f32 %v933_v63, %v2165_v1 }
 0x1cc   : > { %v1041_v51 = vsel %vm1038_vm3, %v1040_v41, %v1036_v48  ;;  %v1070_v19 = vor.u32 1.1754944e-38, %v1069_v11  ;;  %vm1068_vm11 = vcmp.eq.f32.partialorder %v1067_v9, 8.507059e+37 }
 0x1cd   : > { %v1108_v54 = vmul.f32 %v1100_v47, %v1041_v51  ;;  %v1046_v37 = vmul.f32 %v1658_v40, %v1045_v49  ;;  %v1095_v28 = vmax.f32 %v905_v21, 0.0 }
 0x1cf   : > { %v1660_v56 = vpop.eup %1659  ;;  %v1116_v57 = vadd.f32 %v1108_v54, %v927_v3  ;;  %v1047_v61 = vadd.f32 %v1658_v40, %v1046_v37  ;;  %v1103_v35 = vsub.f32 %v1095_v28, %v934_v34 }
 0x1d0   : > { %v1662_v0 = vpop.eup %1661  ;;  %v967_v62 = vadd.f32 1.0, %v1660_v56 }
 0x1d1   : > { %1124 = vst [vmem:[%s2176_s18 + $0x20] sm:$0xff] %v1116_v57  ;;  %v1051_v46 = vsel %vm1050_vm6, %v1658_v40, %v1047_v61  ;;  %v1059_v6 = vmul.f32 %v1662_v0, %v966_v43  ;;  %vm1064_vm8 = vweird.f32 %v1662_v0 }
 0x1d2   : > { %v1056_v7 = vsel %vm1053_vm7, %v1055_v2, %v1051_v46  ;;  %1663 = vrcp.f32 %v967_v62  ;;  %vm1065_vm10 = vmor %vm1063_vm9, %vm1064_vm8  ;;  %v1084_v22 = vand.u32 2147483648, %v967_v62  ;;  %v1082_v32 = vand.u32 2147483647, %v967_v62 }
 0x1d3   : > { %v1109_v10 = vmul.f32 %v1101_v5, %v1056_v7  ;;  %v1060_v29 = vsub.f32 1.0, %v1059_v6  ;;  %vm1078_vm13 = vweird.f32 %v967_v62 }
 0x1d4   : > { %v1085_v20 = vor.u32 1.1754944e-38, %v1084_v22  ;;  %vm1083_vm15 = vcmp.eq.f32.partialorder %v1082_v32, 8.507059e+37 }
 0x1d5   : > { %v1117_v12 = vadd.f32 %v1109_v10, %v929_v58  ;;  %v1061_v13 = vmul.f32 %v1662_v0, %v1060_v29 }
 0x1d7   : > { %1125 = vst [vmem:[%s2176_s18 + $0x28] sm:$0xff] %v1117_v12  ;;  %v1062_v17 = vadd.f32 %v1662_v0, %v1061_v13 }
 0x1d8   : > { %v1664_v18 = vpop.eup %1663 }
 0x1d9   : > { %v1066_v14 = vsel %vm1065_vm10, %v1662_v0, %v1062_v17  ;;  %v1074_v24 = vmul.f32 %v1664_v18, %v967_v62  ;;  %vm1079_vm12 = vweird.f32 %v1664_v18 }
 0x1da   : > { %v1071_v25 = vsel %vm1068_vm11, %v1070_v19, %v1066_v14  ;;  %vm1080_vm14 = vmor %vm1078_vm13, %vm1079_vm12 }
 0x1db   : > { %v1110_v26 = vmul.f32 %v1102_v23, %v1071_v25  ;;  %v1075_v27 = vsub.f32 1.0, %v1074_v24 }
 0x1dd   : > { %v1118_v30 = vadd.f32 %v1110_v26, %v932_v16  ;;  %v1076_v31 = vmul.f32 %v1664_v18, %v1075_v27 }
 0x1df   : > { %1126 = vst [vmem:[%s2176_s18 + $0x30] sm:$0xff] %v1118_v30  ;;  %v1077_v33 = vadd.f32 %v1664_v18, %v1076_v31 }
 0x1e1   : > { %v1081_v36 = vsel %vm1080_vm14, %v1664_v18, %v1077_v33 }
 0x1e2   : > { %v1086_v38 = vsel %vm1083_vm15, %v1085_v20, %v1081_v36 }
 0x1e3   : > { %v1111_v39 = vmul.f32 %v1103_v35, %v1086_v38 }
 0x1e5   : > { %v1119_v40 = vadd.f32 %v1111_v39, %v934_v34 }
 0x1e7   : > { %1127 = vst [vmem:[%s2176_s18 + $0x38] sm:$0xff] %v1119_v40 }
 0x1e8   : > { %1782 = shalt.err (!%p1779_p10)
}
 0x1e9   : > { %s1833_s22 = smov 128   ;;  %s1834_s24 = smov 8  }
 0x1ea   : > { %1538 = dma.vmem_to_hbm [thread:$0]  (%p1921_p3), %s1142_s16, 1024, %s1144_s29, %s1129_s4, %s1833_s22, %s1833_s22, %s1834_s24  }
 0x1eb PF: > { %s1158_s25 = sand.u32 1, %s1813_s12   ;;  %p2259_p12 = scmp.ge.s32.totalorder %s1825_s15, 2 }
 0x1ec   : > { %s1159_s30 = scalar_lea.sflag [#allocation4], %s1158_s25 }
 0x1ed   : > { %p1552_p13 = pnand %p2259_p12, %p1890_p6 }
 0x1ef   : > { %p1553_p0 = pneg %p1552_p13 }
 0x1f1   : > { %1808 = dma.done.wait (%p1553_p0), %s1159_s30, 1024  }
 0x1f2   : > { %1810 = vsyncadd (%p1553_p0), %s1159_s30, 4294966272  ;;  %p17_p5 = scmp.ge.s32.totalorder %s1911_s6, 4   ;;  %s2260_s12 = smov %s1817_s13 }
 0x1f3   : > { %s2261_s13 = smov %s1821_s14  ;;  %s2262_s14 = smov %s1927_s10 }
 0x1f4   : > { %s2263_s15 = smov %s1911_s6  ;;  %19 = sbr.rel (!%p17_p5) target bundleno = 6 (0x6), region = 87 }
 0x1f9   :  { %1165 = vsyncpa [#allocation3], 1 }
 0x1fa   :  { %1167 = vsyncpa [#allocation3 + $0x1], 1 }
 0x1fb   :  { %1168 = vsyncpa [#allocation6], 1 }
 0x1fc   :  { %1169 = vsyncpa [#allocation4], 1 }
 0x1fd   :  { %1171 = vsyncpa [#allocation4 + $0x1], 1 }

</bundles_post_ra>
